<compile_context>
chip_gen: v7x
topology: tpu7x:2x2x1
jax: 0.10.0
libtpu: 0.0.40
codegen_flags: <defaults>
</compile_context>

<pallas_src>
import jax
import jax.numpy as jnp
from jax.experimental import pallas as pl
from jax.experimental.pallas import tpu as pltpu

HIDDEN = 768                  # RoBERTa hidden size (hard-coded by the conv kernels)
C1, C2, C3 = 64, 128, 256
CAT = C1 + C2 + C3            # 448
CAT_PAD = 512                 # fused conv output / fc K padded to a 128/256 multiple
NUM_CLASSES = 10              # NUM_CLASSES is external in the original script; pick 10
NC_PAD = 128                  # lane-dense logits width; real logits are [:, :NUM_CLASSES]
B_PACK = CAT_PAD + NC_PAD     # 640: both biases packed into one lane-dense row


def head_kernel(x_ref, wc_ref, wf_ref, b_ref, out_ref):
    # x: (TM, 768) f32 -> bf16 inside the kernel (no wrapper-side cast op).
    x = x_ref[...].astype(jnp.bfloat16)
    bc = b_ref[:, :CAT_PAD]                       # (1, 512) f32, static Ref slice
    bf = b_ref[:, CAT_PAD:]                       # (1, 128) f32, static Ref slice
    # Fused conv1/conv2/conv3: one bf16 MXU dot, f32 accumulate, fused bias+ReLU.
    h = jnp.maximum(
        jnp.dot(x, wc_ref[...], preferred_element_type=jnp.float32) + bc,
        0.0)                                      # (TM, 512) f32
    # fc over the (zero-padded) concat axis, kept fully in f32 for parity.
    out_ref[...] = (
        jnp.dot(h, wf_ref[...], preferred_element_type=jnp.float32) + bf)


def cnn_attention_head(pooled, packed, *, block_rows=256):
    """pooled: (B, HIDDEN) f32 CLS embeddings. Returns (B, NUM_CLASSES) f32."""
    wc, wf, b = packed
    B = pooled.shape[0]
    TM = B if B <= block_rows else block_rows
    B_pad = ((B + TM - 1) // TM) * TM
    x = pooled if B_pad == B else jnp.pad(pooled, ((0, B_pad - B), (0, 0)))
    grid = (B_pad // TM,)

    out = pl.pallas_call(
        head_kernel,
        out_shape=jax.ShapeDtypeStruct((B_pad, NC_PAD), jnp.float32),
        grid=grid,
        in_specs=[
            pl.BlockSpec((TM, HIDDEN), lambda i: (i, 0)),          # x: tiled rows
            pl.BlockSpec((HIDDEN, CAT_PAD), lambda i: (0, 0)),     # wc: VMEM-resident
            pl.BlockSpec((CAT_PAD, NC_PAD), lambda i: (0, 0)),     # wf: VMEM-resident
            pl.BlockSpec((1, B_PACK), lambda i: (0, 0)),           # packed biases
        ],
        out_specs=pl.BlockSpec((TM, NC_PAD), lambda i: (i, 0)),
        compiler_params=pltpu.CompilerParams(
            dimension_semantics=("parallel",)),
    )(x, wc, wf, b)
    return out[:B, :NUM_CLASSES]


def init_params(key):
    """Original (unfused, f32) parameters, matching the PyTorch layer shapes."""
    ks = jax.random.split(key, 8)
    sc = 1.0 / jnp.sqrt(HIDDEN)
    sf = 1.0 / jnp.sqrt(CAT)
    # conv weights stored pre-transposed: (HIDDEN, out_channels)
    w1t = jax.random.normal(ks[0], (HIDDEN, C1), jnp.float32) * sc
    b1 = jax.random.normal(ks[1], (C1,), jnp.float32) * sc
    w2t = jax.random.normal(ks[2], (HIDDEN, C2), jnp.float32) * sc
    b2 = jax.random.normal(ks[3], (C2,), jnp.float32) * sc
    w3t = jax.random.normal(ks[4], (HIDDEN, C3), jnp.float32) * sc
    b3 = jax.random.normal(ks[5], (C3,), jnp.float32) * sc
    # fc weight pre-transposed: (CAT, NUM_CLASSES)
    wfc_t = jax.random.normal(ks[6], (CAT, NUM_CLASSES), jnp.float32) * sf
    bfc = jax.random.normal(ks[7], (NUM_CLASSES,), jnp.float32) * sf
    return (w1t, b1, w2t, b2, w3t, b3, wfc_t, bfc)


def pack_params(params):
    """One-time packing: fuse conv weights (bf16), pad, pack both biases into one row."""
    w1t, b1, w2t, b2, w3t, b3, wfc_t, bfc = params
    wc = jnp.concatenate([w1t, w2t, w3t], axis=1)                           # (768, 448)
    wc = jnp.pad(wc, ((0, 0), (0, CAT_PAD - CAT))).astype(jnp.bfloat16)     # (768, 512) bf16
    wf = jnp.pad(wfc_t, ((0, CAT_PAD - CAT),
                         (0, NC_PAD - NUM_CLASSES))).astype(jnp.float32)    # (512, 128) f32
    bc = jnp.pad(jnp.concatenate([b1, b2, b3], axis=0), (0, CAT_PAD - CAT))  # (512,)
    bf = jnp.pad(bfc, (0, NC_PAD - NUM_CLASSES))                             # (128,)
    b = jnp.concatenate([bc, bf], axis=0).reshape(1, B_PACK).astype(jnp.float32)
    return (wc, wf, b)


def ref_forward_f32(pooled, params):
    """Pure-f32 reference matching the PyTorch module semantics."""
    w1t, b1, w2t, b2, w3t, b3, wfc_t, bfc = params
    h1 = jnp.maximum(pooled @ w1t + b1, 0.0)
    h2 = jnp.maximum(pooled @ w2t + b2, 0.0)
    h3 = jnp.maximum(pooled @ w3t + b3, 0.0)
    x = jnp.concatenate([h1, h2, h3], axis=-1)
    return x @ wfc_t + bfc


def ref_forward_packed(pooled, packed):
    """Reference using identical fused weights / dtypes (dtype-matched check)."""
    wc, wf, b = packed
    bc = b[:, :CAT_PAD]
    bf = b[:, CAT_PAD:]
    xb = pooled.astype(jnp.bfloat16)
    h = jnp.maximum(jnp.dot(xb, wc, preferred_element_type=jnp.float32) + bc, 0.0)
    logits = jnp.dot(h, wf, preferred_element_type=jnp.float32) + bf
    return logits[:, :NUM_CLASSES]


if __name__ == "__main__":
    key = jax.random.PRNGKey(0)
    k_hidden, k_params, k_big = jax.random.split(key, 3)
    params = init_params(k_params)
    packed = pack_params(params)

    # --- Small-shape run (matches the module's per-request path) ---------------
    B, SEQ = 2, 8
    # Stand-in for roberta(input_ids, attention_mask).last_hidden_state
    last_hidden_state = jax.random.normal(k_hidden, (B, SEQ, HIDDEN), jnp.float32)
    pooled_output = last_hidden_state[:, 0, :]          # (B, 768)  CLS token

    logits = cnn_attention_head(pooled_output, packed)
    logits = jax.block_until_ready(logits)
    assert logits.shape == (B, NUM_CLASSES)

    # Dtype-matched check (same bf16 conv weights / f32 fc / f32 accumulation).
    expected_bf16 = ref_forward_packed(pooled_output, packed)
    assert jnp.allclose(logits, expected_bf16, atol=1e-2, rtol=1e-2)

    # Semantic check against the full-f32 PyTorch-equivalent reference
    # (looser tolerance: bf16 conv weights / bf16 activations in the kernel).
    expected_f32 = ref_forward_f32(pooled_output, params)
    assert jnp.allclose(logits, expected_f32, atol=1e-1, rtol=1e-1)

    # --- Multi-step grid path (weights resident across grid steps, ragged B) ---
    B2 = 10
    pooled_big = jax.random.normal(k_big, (B2, HIDDEN), jnp.float32)
    logits_big = cnn_attention_head(pooled_big, packed, block_rows=8)  # grid=(2,)
    logits_big = jax.block_until_ready(logits_big)
    assert logits_big.shape == (B2, NUM_CLASSES)
    assert jnp.allclose(logits_big, ref_forward_packed(pooled_big, packed),
                        atol=1e-2, rtol=1e-2)
    assert jnp.allclose(logits_big, ref_forward_f32(pooled_big, params),
                        atol=1e-1, rtol=1e-1)

    print("KERNEL_OK")
</pallas_src>

<mosaic_0001>
module attributes {stable_mosaic.version = 11 : i64} {
  func.func @head_kernel(%arg0: i32, %arg1: memref<2x768xf32, #tpu.memory_space<vmem>>, %arg2: memref<768x512xbf16, #tpu.memory_space<vmem>>, %arg3: memref<512x128xf32, #tpu.memory_space<vmem>>, %arg4: memref<1x640xf32, #tpu.memory_space<vmem>>, %arg5: memref<2x128xf32, #tpu.memory_space<vmem>>) attributes {dimension_semantics = [#tpu.dimension_semantics<parallel>], iteration_bounds = array<i64: 1>, scalar_prefetch = 0 : i64, scratch_operands = 0 : i64, tpu.core_type = #tpu.core_type<tc>, window_params = [{transform_indices = @transform_0, window_bounds = array<i64: 2, 768>}, {pipeline_mode = #tpu.pipeline_mode<synchronous>, transform_indices = @transform_1, window_bounds = array<i64: 768, 512>}, {pipeline_mode = #tpu.pipeline_mode<synchronous>, transform_indices = @transform_2, window_bounds = array<i64: 512, 128>}, {pipeline_mode = #tpu.pipeline_mode<synchronous>, transform_indices = @transform_3, window_bounds = array<i64: 1, 640>}, {transform_indices = @transform_4, window_bounds = array<i64: 2, 128>}]} {
    %c0 = arith.constant 0 : index
    %c0_0 = arith.constant 0 : index
    %0 = vector.load %arg1[%c0, %c0_0] : memref<2x768xf32, #tpu.memory_space<vmem>>, vector<2x768xf32>
    %1 = arith.truncf %0 : vector<2x768xf32> to vector<2x768xbf16>
    %c0_1 = arith.constant 0 : index
    %c0_2 = arith.constant 0 : index
    %2 = vector.load %arg4[%c0_1, %c0_2] : memref<1x640xf32, #tpu.memory_space<vmem>>, vector<1x512xf32>
    %c0_3 = arith.constant 0 : index
    %c512 = arith.constant 512 : index
    %3 = vector.load %arg4[%c0_3, %c512] : memref<1x640xf32, #tpu.memory_space<vmem>>, vector<1x128xf32>
    %c0_4 = arith.constant 0 : index
    %c0_5 = arith.constant 0 : index
    %4 = vector.load %arg2[%c0_4, %c0_5] : memref<768x512xbf16, #tpu.memory_space<vmem>>, vector<768x512xbf16>
    %cst = arith.constant dense<0.000000e+00> : vector<2x512xf32>
    %5 = tpu.matmul %1, %4, %cst {dimension_numbers = #tpu.dot_dimension_numbers<[1], [0], [0], [1], [0, 0, 1, 1], [], []>} : vector<2x768xbf16>, vector<768x512xbf16>, vector<2x512xf32> -> vector<2x512xf32>
    %6 = vector.broadcast %2 : vector<1x512xf32> to vector<2x512xf32>
    %7 = arith.addf %5, %6 : vector<2x512xf32>
    %cst_6 = arith.constant 0.000000e+00 : f32
    %8 = vector.broadcast %cst_6 : f32 to vector<2x512xf32>
    %9 = arith.maximumf %7, %8 : vector<2x512xf32>
    %c0_7 = arith.constant 0 : index
    %c0_8 = arith.constant 0 : index
    %10 = vector.load %arg3[%c0_7, %c0_8] : memref<512x128xf32, #tpu.memory_space<vmem>>, vector<512x128xf32>
    %cst_9 = arith.constant dense<0.000000e+00> : vector<2x128xf32>
    %11 = tpu.matmul %9, %10, %cst_9 {dimension_numbers = #tpu.dot_dimension_numbers<[1], [0], [0], [1], [0, 0, 1, 1], [], []>} : vector<2x512xf32>, vector<512x128xf32>, vector<2x128xf32> -> vector<2x128xf32>
    %12 = vector.broadcast %3 : vector<1x128xf32> to vector<2x128xf32>
    %13 = arith.addf %11, %12 : vector<2x128xf32>
    %c0_10 = arith.constant 0 : index
    %c0_11 = arith.constant 0 : index
    %14 = vector.load %arg5[%c0_10, %c0_11] : memref<2x128xf32, #tpu.memory_space<vmem>>, vector<2x128xf32>
    tpu.vector_store %arg5[%c0_10, %c0_11], %13 {strides = array<i32>} : memref<2x128xf32, #tpu.memory_space<vmem>>, vector<2x128xf32>,
    return
  }
  func.func @transform_0(%arg0: i32) -> (i32, i32) {
    %c0_i32 = arith.constant 0 : i32
    %c0_i32_0 = arith.constant 0 : i32
    return %arg0, %c0_i32 : i32, i32
  }
  func.func @transform_1(%arg0: i32) -> (i32, i32) {
    %c0_i32 = arith.constant 0 : i32
    %c0_i32_0 = arith.constant 0 : i32
    %c0_i32_1 = arith.constant 0 : i32
    return %c0_i32, %c0_i32_0 : i32, i32
  }
  func.func @transform_2(%arg0: i32) -> (i32, i32) {
    %c0_i32 = arith.constant 0 : i32
    %c0_i32_0 = arith.constant 0 : i32
    %c0_i32_1 = arith.constant 0 : i32
    return %c0_i32, %c0_i32_0 : i32, i32
  }
  func.func @transform_3(%arg0: i32) -> (i32, i32) {
    %c0_i32 = arith.constant 0 : i32
    %c0_i32_0 = arith.constant 0 : i32
    %c0_i32_1 = arith.constant 0 : i32
    return %c0_i32, %c0_i32_0 : i32, i32
  }
  func.func @transform_4(%arg0: i32) -> (i32, i32) {
    %c0_i32 = arith.constant 0 : i32
    %c0_i32_0 = arith.constant 0 : i32
    return %arg0, %c0_i32 : i32, i32
  }
}

</mosaic_0001>

<bundles_post_ra>
// kernel: tpu_custom_call.1
= control target key start
LH: loop header
LB: loop body
LE: loop exit
PB: predicated region body
PF: predicated region fallthrough
CT: control target
= control target key end

     0   :  { %9 = vsyncpa [#allocation3], 0  ;;  %s2597_s0 = inlined_call_operand.hbm [shape: f32[2,768], index: 0, kind: input, shape index: {}]   ;;  %s2598_s1 = inlined_call_operand.hbm [shape: bf16[768,512], index: 1, kind: input, shape index: {}]   ;;  %s2599_s2 = inlined_call_operand.hbm [shape: f32[512,128], index: 2, kind: input, shape index: {}]   ;;  %s2600_s3 = inlined_call_operand.vmem [shape: f32[1,640], index: 3, kind: input, shape index: {}]   ;;  %s2601_s4 = inlined_call_operand.hbm [shape: f32[2,128], index: 4, kind: output, shape index: {}]  }
   0x1   :  { %10 = vsyncpa [#allocation6], 0 }
   0x2   :  { %11 = vsyncpa [#allocation4], 0  ;;  %s2490_s15 = smov [#allocation5]   ;;  %s2396_s19 = scalar_lea.hbm %s2598_s1, 24576 }
   0x3   :  { %s27_s16 = sshll.u32 %s2490_s15, 4  ;;  %p2397_p0 = scmp.ne.s32.totalorder %s2598_s1, %s2396_s19  ;;  %s28_s16 = int_to_ptr.vmem [resolvable:$true] %s27_s16 }
   0x4   :  { %p2400_p1 = scmp.lt.u32.totalorder %s2396_s19, %s2598_s1 }
   0x6   :  { %p2402_p2 = pnand %p2400_p1, %p2397_p0 }
   0x8   :  { %2405 = shalt.err (!%p2402_p2)
}
   0x9   :  { %s2406_s24 = scalar_lea.vmem %s28_s16, 24576  ;;  %p2411_p4 = scmp.lt.s32.totalorder %s28_s16, %s28_s16 }
   0xa   :  { %p2407_p3 = scmp.ne.s32.totalorder %s28_s16, %s2406_s24  ;;  %p2412_p5 = scmp.lt.s32.totalorder %s2406_s24, %s2406_s24 }
   0xc   :  { %p2413_p6 = por %p2412_p5, %p2411_p4 }
   0xe   :  { %p2414_p7 = pnand %p2413_p6, %p2407_p3 }
  0x10   :  { %2417 = shalt.err (!%p2414_p7)
}
  0x11   :  { %s2491_s25 = smov 256   ;;  %s2492_s26 = smov 16  }
  0x12   :  { %33 = dma.hbm_to_vmem [thread:$0]  %s2598_s1, 24576, %s28_s16, [#allocation6], %s2491_s25, %s2491_s25, %s2492_s26  }
  0x13   :  { %s2493_s29 = smov [#allocation2]   ;;  %s2494_s5 = smov [#allocation7]  }
  0x14   :  { %s18_s30 = sshll.u32 %s2493_s29, 4  ;;  %s39_s6 = sshll.u32 %s2494_s5, 4  ;;  %s19_s30 = int_to_ptr.vmem [resolvable:$true] %s18_s30  ;;  %s40_s6 = int_to_ptr.vmem [resolvable:$true] %s39_s6 }
  0x15   :  { %s2418_s9 = scalar_lea.hbm %s2597_s0, 192 }
  0x16   :  { %p2419_p8 = scmp.ne.s32.totalorder %s2597_s0, %s2418_s9  ;;  %p2422_p9 = scmp.lt.u32.totalorder %s2418_s9, %s2597_s0 }
  0x18   :  { %p2424_p10 = pnand %p2422_p9, %p2419_p8 }
  0x1a   :  { %2427 = shalt.err (!%p2424_p10)
}
  0x1b   :  { %s2428_s1 = scalar_lea.vmem %s19_s30, 192  ;;  %p2433_p12 = scmp.lt.s32.totalorder %s19_s30, %s19_s30 }
  0x1c   :  { %p2429_p11 = scmp.ne.s32.totalorder %s19_s30, %s2428_s1  ;;  %p2434_p13 = scmp.lt.s32.totalorder %s2428_s1, %s2428_s1 }
  0x1e   :  { %p2435_p0 = por %p2434_p13, %p2433_p12 }
  0x20   :  { %p2436_p1 = pnand %p2435_p0, %p2429_p11 }
  0x22   :  { %2439 = shalt.err (!%p2436_p1)
}
  0x23   :  { %21 = dma.hbm_to_vmem [thread:$0]  %s2597_s0, 192, %s19_s30, [#allocation3]  }
  0x24   :  { %s2440_s18 = scalar_lea.hbm %s2599_s2, 8192 }
  0x25   :  { %p2441_p2 = scmp.ne.s32.totalorder %s2599_s2, %s2440_s18  ;;  %p2444_p3 = scmp.lt.u32.totalorder %s2440_s18, %s2599_s2 }
  0x27   :  { %p2446_p4 = pnand %p2444_p3, %p2441_p2 }
  0x29   :  { %2449 = shalt.err (!%p2446_p4)
}
  0x2a   :  { %s2450_s23 = scalar_lea.vmem %s40_s6, 8192  ;;  %p2455_p6 = scmp.lt.s32.totalorder %s40_s6, %s40_s6 }
  0x2b   :  { %p2451_p5 = scmp.ne.s32.totalorder %s40_s6, %s2450_s23  ;;  %p2456_p7 = scmp.lt.s32.totalorder %s2450_s23, %s2450_s23 }
  0x2d   :  { %p2457_p8 = por %p2456_p7, %p2455_p6 }
  0x2f   :  { %p2458_p9 = pnand %p2457_p8, %p2451_p5 }
  0x31   :  { %2461 = shalt.err (!%p2458_p9)
}
  0x32   :  { %s2495_s0 = smov 128   ;;  %s2496_s24 = smov 8  }
  0x33   :  { %45 = dma.hbm_to_vmem [thread:$0]  %s2599_s2, 8192, %s40_s6, [#allocation6], %s2495_s0, %s2495_s0, %s2496_s24  }
  0x34   :  { %2484 = dma.done.wait [#allocation3], 192  }
  0x35   :  { %2485 = vsyncadd [#allocation3], 4294967104 }
  0x36   :  { %2486 = dma.done.wait [#allocation6], 32768  }
  0x37   :  { %2487 = vsyncadd [#allocation6], 4294934528  ;;  %v2107_v0 = vld [vmem:[#allocation5 + $0x4] ss:$16 sps:$4 sm:$0xff]   ;;  %v2109_v1 = vld [vmem:[#allocation5 + $0xc] ss:$16 sps:$4 sm:$0xff]   ;;  %v65_v38 = vlaneseq }
  0x38   :  { %1273 = vmatprep.subr.bf16.mxu0 %v2107_v0  ;;  %v2111_v2 = vld [vmem:[#allocation5] ss:$16 sps:$4 sm:$0xff]   ;;  %v2112_v3 = vld [vmem:[#allocation5 + $0x8] ss:$16 sps:$4 sm:$0xff]   ;;  %1396 = vmatprep.subr.bf16.mxu1 %v2109_v1  ;;  %v2113_v4 = vld [vmem:[#allocation5 + $0x24] ss:$16 sps:$4 sm:$0xff]  }
  0x39   :  { %1274 = vmatpush1.bf16.msra.mxu0 %v2111_v2  ;;  %1397 = vmatpush1.bf16.msra.mxu1 %v2112_v3  ;;  %v2115_v5 = vld [vmem:[#allocation5 + $0x2c] ss:$16 sps:$4 sm:$0xff]   ;;  %v2117_v6 = vld [vmem:[#allocation5 + $0x20] ss:$16 sps:$4 sm:$0xff]   ;;  %v2118_v7 = vld [vmem:[#allocation5 + $0x28] ss:$16 sps:$4 sm:$0xff]  }
  0x3a   :  { %1275 = vmatprep.subr.bf16.mxu0 %v2113_v4  ;;  %1398 = vmatprep.subr.bf16.mxu1 %v2115_v5  ;;  %v2119_v8 = vld [vmem:[#allocation5 + $0x44] ss:$16 sps:$4 sm:$0xff]   ;;  %v2121_v9 = vld [vmem:[#allocation5 + $0x4c] ss:$16 sps:$4 sm:$0xff]   ;;  %v2123_v10 = vld [vmem:[#allocation5 + $0x40] ss:$16 sps:$4 sm:$0xff]  }
  0x3b   :  { %v2124_v11 = vld [vmem:[#allocation5 + $0x48] ss:$16 sps:$4 sm:$0xff]   ;;  %v2125_v12 = vld [vmem:[#allocation5 + $0x64] ss:$16 sps:$4 sm:$0xff]   ;;  %v2127_v13 = vld [vmem:[#allocation5 + $0x6c] ss:$16 sps:$4 sm:$0xff]  }
  0x3c   :  { %v2129_v14 = vld [vmem:[#allocation5 + $0x60] ss:$16 sps:$4 sm:$0xff]   ;;  %v2130_v15 = vld [vmem:[#allocation5 + $0x68] ss:$16 sps:$4 sm:$0xff]   ;;  %v2131_v16 = vld [vmem:[#allocation5 + $0x84] ss:$16 sps:$4 sm:$0xff]  }
  0x3d   :  { %1276 = vmatpush1.bf16.msra.mxu0 %v2117_v6  ;;  %1399 = vmatpush1.bf16.msra.mxu1 %v2118_v7  ;;  %v2133_v17 = vld [vmem:[#allocation5 + $0x8c] ss:$16 sps:$4 sm:$0xff]   ;;  %v2135_v18 = vld [vmem:[#allocation5 + $0x80] ss:$16 sps:$4 sm:$0xff]   ;;  %v2136_v19 = vld [vmem:[#allocation5 + $0x88] ss:$16 sps:$4 sm:$0xff]  }
  0x3e   :  { %1277 = vmatprep.subr.bf16.mxu0 %v2119_v8  ;;  %1400 = vmatprep.subr.bf16.mxu1 %v2121_v9  ;;  %v2137_v20 = vld [vmem:[#allocation5 + $0xa4] ss:$16 sps:$4 sm:$0xff]   ;;  %v2139_v21 = vld [vmem:[#allocation5 + $0xac] ss:$16 sps:$4 sm:$0xff]   ;;  %v2141_v22 = vld [vmem:[#allocation5 + $0xa0] ss:$16 sps:$4 sm:$0xff]  }
  0x3f   :  { %v2142_v23 = vld [vmem:[#allocation5 + $0xa8] ss:$16 sps:$4 sm:$0xff]   ;;  %v2143_v24 = vld [vmem:[#allocation5 + $0xc4] ss:$16 sps:$4 sm:$0xff]   ;;  %v2145_v25 = vld [vmem:[#allocation5 + $0xcc] ss:$16 sps:$4 sm:$0xff]  }
  0x40   :  { %v2147_v26 = vld [vmem:[#allocation5 + $0xc0] ss:$16 sps:$4 sm:$0xff]   ;;  %v2148_v27 = vld [vmem:[#allocation5 + $0xc8] ss:$16 sps:$4 sm:$0xff]   ;;  %v2149_v28 = vld [vmem:[#allocation5 + $0xe4] ss:$16 sps:$4 sm:$0xff]  }
  0x41   :  { %1278 = vmatpush1.bf16.msra.mxu0 %v2123_v10  ;;  %1401 = vmatpush1.bf16.msra.mxu1 %v2124_v11  ;;  %v2151_v29 = vld [vmem:[#allocation5 + $0xec] ss:$16 sps:$4 sm:$0xff]   ;;  %v2153_v30 = vld [vmem:[#allocation5 + $0xe0] ss:$16 sps:$4 sm:$0xff]   ;;  %v2154_v31 = vld [vmem:[#allocation5 + $0xe8] ss:$16 sps:$4 sm:$0xff]  }
  0x42   :  { %1279 = vmatprep.subr.bf16.mxu0 %v2125_v12  ;;  %1402 = vmatprep.subr.bf16.mxu1 %v2127_v13  ;;  %v2155_v32 = vld [vmem:[#allocation5 + $0x104] ss:$16 sps:$4 sm:$0xff]   ;;  %v2157_v33 = vld [vmem:[#allocation5 + $0x10c] ss:$16 sps:$4 sm:$0xff]   ;;  %v2159_v34 = vld [vmem:[#allocation5 + $0x100] ss:$16 sps:$4 sm:$0xff]  }
  0x43   :  { %v2160_v35 = vld [vmem:[#allocation5 + $0x108] ss:$16 sps:$4 sm:$0xff]   ;;  %v2497_v36 = vmov 1983009808   ;;  %v2161_v39 = vld [vmem:[#allocation5 + $0x124] ss:$16 sps:$4 sm:$0xff]  }
  0x44   :  { %v63_v37 = vunpack.c.l.s4 %v2497_v36  ;;  %v2163_v40 = vld [vmem:[#allocation5 + $0x12c] ss:$16 sps:$4 sm:$0xff]   ;;  %v2165_v41 = vld [vmem:[#allocation5 + $0x120] ss:$16 sps:$4 sm:$0xff]   ;;  %v2560_v43 = vshrl.u32 %v65_v38, 7  ;;  %v57_v52 = vld [vmem:[#allocation2] sm:$0xff] }
  0x45   :  { %1280 = vmatpush1.bf16.msra.mxu0 %v2129_v14  ;;  %1403 = vmatpush1.bf16.msra.mxu1 %v2130_v15  ;;  %v2166_v44 = vld [vmem:[#allocation5 + $0x128] ss:$16 sps:$4 sm:$0xff]   ;;  %v2167_v45 = vld [vmem:[#allocation5 + $0x144] ss:$16 sps:$4 sm:$0xff]   ;;  %v2169_v46 = vld [vmem:[#allocation5 + $0x14c] ss:$16 sps:$4 sm:$0xff]   ;;  %v61_v4 = vcombine.high %v57_v52, %v57_v52 }
  0x46   :  { %1281 = vmatprep.subr.bf16.mxu0 %v2131_v16  ;;  %1404 = vmatprep.subr.bf16.mxu1 %v2133_v17  ;;  %v64_v42 = vunpack.c.0.s8 %v63_v37  ;;  %v2171_v47 = vld [vmem:[#allocation5 + $0x140] ss:$16 sps:$4 sm:$0xff]   ;;  %v2172_v48 = vld [vmem:[#allocation5 + $0x148] ss:$16 sps:$4 sm:$0xff]   ;;  %v2173_v50 = vld [vmem:[#allocation5 + $0x164] ss:$16 sps:$4 sm:$0xff]  }
  0x47   :  { %v2175_v51 = vld [vmem:[#allocation5 + $0x16c] ss:$16 sps:$4 sm:$0xff]   ;;  %v2177_v53 = vld [vmem:[#allocation5 + $0x160] ss:$16 sps:$4 sm:$0xff]   ;;  %v2178_v55 = vld [vmem:[#allocation5 + $0x168] ss:$16 sps:$4 sm:$0xff]  }
  0x48   :  { %v67_v49 = vsub.s32 %v64_v42, %v2560_v43  ;;  %v2179_v56 = vld [vmem:[#allocation5 + $0x184] ss:$16 sps:$4 sm:$0xff]   ;;  %v2181_v57 = vld [vmem:[#allocation5 + $0x18c] ss:$16 sps:$4 sm:$0xff]   ;;  %v2183_v59 = vld [vmem:[#allocation5 + $0x180] ss:$16 sps:$4 sm:$0xff]  }
  0x49   :  { %1282 = vmatpush1.bf16.msra.mxu0 %v2135_v18  ;;  %1405 = vmatpush1.bf16.msra.mxu1 %v2136_v19  ;;  %v2184_v61 = vld [vmem:[#allocation5 + $0x188] ss:$16 sps:$4 sm:$0xff]   ;;  %v2185_v62 = vld [vmem:[#allocation5 + $0x1a4] ss:$16 sps:$4 sm:$0xff]   ;;  %v2187_v63 = vld [vmem:[#allocation5 + $0x1ac] ss:$16 sps:$4 sm:$0xff]  }
  0x4a   :  { %1283 = vmatprep.subr.bf16.mxu0 %v2137_v20  ;;  %1406 = vmatprep.subr.bf16.mxu1 %v2139_v21  ;;  %v68_v54 = vrot.slane %v57_v52, %v67_v49  ;;  %v2189_v0 = vld [vmem:[#allocation5 + $0x1a0] ss:$16 sps:$4 sm:$0xff]   ;;  %v2190_v1 = vld [vmem:[#allocation5 + $0x1a8] ss:$16 sps:$4 sm:$0xff]   ;;  %v2191_v2 = vld [vmem:[#allocation5 + $0x1c4] ss:$16 sps:$4 sm:$0xff]   ;;  %v2563_v9 = vrot.slane %v61_v4, %v67_v49 }
  0x4b   :  { %v2193_v3 = vld [vmem:[#allocation5 + $0x1cc] ss:$16 sps:$4 sm:$0xff]   ;;  %v2195_v5 = vld [vmem:[#allocation5 + $0x1c0] ss:$16 sps:$4 sm:$0xff]   ;;  %v2196_v6 = vld [vmem:[#allocation5 + $0x1c8] ss:$16 sps:$4 sm:$0xff]  }
  0x4c   :  { %v76_v58 = vcombine.high %v68_v54, %v68_v54  ;;  %v2197_v7 = vld [vmem:[#allocation5 + $0x1e4] ss:$16 sps:$4 sm:$0xff]   ;;  %v2199_v8 = vld [vmem:[#allocation5 + $0x1ec] ss:$16 sps:$4 sm:$0xff]   ;;  %v2201_v10 = vld [vmem:[#allocation5 + $0x1e0] ss:$16 sps:$4 sm:$0xff]   ;;  %v77_v14 = vcombine.high %v2563_v9, %v2563_v9  ;;  %v92_v16 = vpack.c.bf16 %v68_v54, %v68_v54 }
  0x4d   :  { %1284 = vmatpush1.bf16.msra.mxu0 %v2141_v22  ;;  %1407 = vmatpush1.bf16.msra.mxu1 %v2142_v23  ;;  %v2202_v11 = vld [vmem:[#allocation5 + $0x1e8] ss:$16 sps:$4 sm:$0xff]   ;;  %v2206_v12 = vld [vmem:[#allocation5 + $0x204] ss:$16 sps:$4 sm:$0xff]   ;;  %v2209_v13 = vld [vmem:[#allocation5 + $0x20c] ss:$16 sps:$4 sm:$0xff]  }
  0x4e   :  { %1285 = vmatprep.subr.bf16.mxu0 %v2143_v24  ;;  %1408 = vmatprep.subr.bf16.mxu1 %v2145_v25  ;;  %v93_v60 = vpack.c.bf16 %v76_v58, %v76_v58  ;;  %v2204_v15 = vld [vmem:[#allocation5 + $0x200] ss:$16 sps:$4 sm:$0xff]   ;;  %v2207_v17 = vld [vmem:[#allocation5 + $0x208] ss:$16 sps:$4 sm:$0xff]   ;;  %v2212_v18 = vld [vmem:[#allocation5 + $0x224] ss:$16 sps:$4 sm:$0xff]   ;;  %v95_v20 = vpack.c.bf16 %v77_v14, %v77_v14 }
  0x4f   :  { %v2215_v19 = vld [vmem:[#allocation5 + $0x22c] ss:$16 sps:$4 sm:$0xff]   ;;  %v2210_v21 = vld [vmem:[#allocation5 + $0x220] ss:$16 sps:$4 sm:$0xff]   ;;  %v2213_v22 = vld [vmem:[#allocation5 + $0x228] ss:$16 sps:$4 sm:$0xff]  }
  0x50   :  { %1305 = vmatprep.mubr.bf16.mxu0 %v93_v60  ;;  %1428 = vmatprep.mubr.bf16.mxu1 %v93_v60  ;;  %v2218_v23 = vld [vmem:[#allocation5 + $0x244] ss:$16 sps:$4 sm:$0xff]   ;;  %v2221_v24 = vld [vmem:[#allocation5 + $0x24c] ss:$16 sps:$4 sm:$0xff]   ;;  %v2216_v25 = vld [vmem:[#allocation5 + $0x240] ss:$16 sps:$4 sm:$0xff]  }
  0x51   :  { %1286 = vmatpush1.bf16.msra.mxu0 %v2147_v26  ;;  %1409 = vmatpush1.bf16.msra.mxu1 %v2148_v27  ;;  %v2219_v26 = vld [vmem:[#allocation5 + $0x248] ss:$16 sps:$4 sm:$0xff]   ;;  %v2224_v27 = vld [vmem:[#allocation5 + $0x264] ss:$16 sps:$4 sm:$0xff]   ;;  %v2239_v36 = vld [vmem:[#allocation5 + $0x2ac] ss:$16 sps:$4 sm:$0xff]  }
  0x52   :  { %1287 = vmatprep.subr.bf16.mxu0 %v2149_v28  ;;  %1410 = vmatprep.subr.bf16.mxu1 %v2151_v29  ;;  %v2227_v28 = vld [vmem:[#allocation5 + $0x26c] ss:$16 sps:$4 sm:$0xff]   ;;  %v2222_v29 = vld [vmem:[#allocation5 + $0x260] ss:$16 sps:$4 sm:$0xff]   ;;  %v2237_v38 = vld [vmem:[#allocation5 + $0x2a8] ss:$16 sps:$4 sm:$0xff]  }
  0x53   :  { %v2234_v37 = vld [vmem:[#allocation5 + $0x2a0] ss:$16 sps:$4 sm:$0xff]   ;;  %v2243_v42 = vld [vmem:[#allocation5 + $0x2c8] ss:$16 sps:$4 sm:$0xff]   ;;  %v2257_v49 = vld [vmem:[#allocation5 + $0x30c] ss:$16 sps:$4 sm:$0xff]  }
  0x54   :  { %v2260_v52 = vld [vmem:[#allocation5 + $0x324] ss:$16 sps:$4 sm:$0xff]   ;;  %v2258_v54 = vld [vmem:[#allocation5 + $0x320] ss:$16 sps:$4 sm:$0xff]   ;;  %v2299_v14 = vld [vmem:[#allocation5 + $0x3ec] ss:$16 sps:$4 sm:$0xff]  }
  0x55   :  { %1288 = vmatpush1.bf16.msra.mxu0 %v2153_v30  ;;  %1411 = vmatpush1.bf16.msra.mxu1 %v2154_v31  ;;  %v2225_v30 = vld [vmem:[#allocation5 + $0x268] ss:$16 sps:$4 sm:$0xff]   ;;  %v2230_v31 = vld [vmem:[#allocation5 + $0x284] ss:$16 sps:$4 sm:$0xff]   ;;  %v2264_v58 = vld [vmem:[#allocation5 + $0x340] ss:$16 sps:$4 sm:$0xff]  }
  0x56   :  { %1289 = vmatprep.subr.bf16.mxu0 %v2155_v32  ;;  %1412 = vmatprep.subr.bf16.mxu1 %v2157_v33  ;;  %v2233_v32 = vld [vmem:[#allocation5 + $0x28c] ss:$16 sps:$4 sm:$0xff]   ;;  %v2228_v33 = vld [vmem:[#allocation5 + $0x280] ss:$16 sps:$4 sm:$0xff]   ;;  %v2272_v60 = vld [vmem:[#allocation5 + $0x364] ss:$16 sps:$4 sm:$0xff]  }
  0x57   :  { %v2284_v4 = vld [vmem:[#allocation5 + $0x3a4] ss:$16 sps:$4 sm:$0xff]   ;;  %s2498_s30 = smov [#allocation8]  }
  0x58   :  { %s1740_s5 = sshll.u32 %s2498_s30, 4  ;;  %s1741_s5 = int_to_ptr.vmem [resolvable:$true] %s1740_s5 }
  0x59   :  { %1290 = vmatpush1.bf16.msra.mxu0 %v2159_v34  ;;  %1413 = vmatpush1.bf16.msra.mxu1 %v2160_v35  ;;  %v2231_v34 = vld [vmem:[#allocation5 + $0x288] ss:$16 sps:$4 sm:$0xff]   ;;  %v2236_v35 = vld [vmem:[#allocation5 + $0x2a4] ss:$16 sps:$4 sm:$0xff]   ;;  %s2462_s6 = scalar_lea.vmem %s1741_s5, 32  ;;  %p2467_p11 = scmp.lt.s32.totalorder %s1741_s5, %s1741_s5 }
  0x5a   :  { %1291 = vmatprep.subr.bf16.mxu0 %v2161_v39  ;;  %1414 = vmatprep.subr.bf16.mxu1 %v2163_v40  ;;  %v2242_v39 = vld [vmem:[#allocation5 + $0x2c4] ss:$16 sps:$4 sm:$0xff]   ;;  %v2245_v40 = vld [vmem:[#allocation5 + $0x2cc] ss:$16 sps:$4 sm:$0xff]   ;;  %p2463_p10 = scmp.ne.s32.totalorder %s1741_s5, %s2462_s6  ;;  %p2468_p12 = scmp.lt.s32.totalorder %s2462_s6, %s2462_s6 }
  0x5c   :  { %p2469_p13 = por %p2468_p12, %p2467_p11 }
  0x5d   :  { %1292 = vmatpush1.bf16.msra.mxu0 %v2165_v41  ;;  %1415 = vmatpush1.bf16.msra.mxu1 %v2166_v44  ;;  %v2240_v41 = vld [vmem:[#allocation5 + $0x2c0] ss:$16 sps:$4 sm:$0xff]   ;;  %v2248_v44 = vld [vmem:[#allocation5 + $0x2e4] ss:$16 sps:$4 sm:$0xff]  }
  0x5e   :  { %1293 = vmatprep.subr.bf16.mxu0 %v2167_v45  ;;  %1416 = vmatprep.subr.bf16.mxu1 %v2169_v46  ;;  %v2251_v45 = vld [vmem:[#allocation5 + $0x2ec] ss:$16 sps:$4 sm:$0xff]   ;;  %v2246_v46 = vld [vmem:[#allocation5 + $0x2e0] ss:$16 sps:$4 sm:$0xff]   ;;  %p2470_p0 = pnand %p2469_p13, %p2463_p10 }
  0x61   :  { %1294 = vmatpush1.bf16.msra.mxu0 %v2171_v47  ;;  %1417 = vmatpush1.bf16.msra.mxu1 %v2172_v48  ;;  %v2249_v47 = vld [vmem:[#allocation5 + $0x2e8] ss:$16 sps:$4 sm:$0xff]   ;;  %v2254_v48 = vld [vmem:[#allocation5 + $0x304] ss:$16 sps:$4 sm:$0xff]  }
  0x62   :  { %1295 = vmatprep.subr.bf16.mxu0 %v2173_v50  ;;  %1418 = vmatprep.subr.bf16.mxu1 %v2175_v51  ;;  %v2252_v50 = vld [vmem:[#allocation5 + $0x300] ss:$16 sps:$4 sm:$0xff]   ;;  %v2255_v51 = vld [vmem:[#allocation5 + $0x308] ss:$16 sps:$4 sm:$0xff]  }
  0x65   :  { %1296 = vmatpush1.bf16.msra.mxu0 %v2177_v53  ;;  %1419 = vmatpush1.bf16.msra.mxu1 %v2178_v55  ;;  %v2263_v53 = vld [vmem:[#allocation5 + $0x32c] ss:$16 sps:$4 sm:$0xff]   ;;  %v2261_v55 = vld [vmem:[#allocation5 + $0x328] ss:$16 sps:$4 sm:$0xff]  }
  0x66   :  { %1297 = vmatprep.subr.bf16.mxu0 %v2179_v56  ;;  %1420 = vmatprep.subr.bf16.mxu1 %v2181_v57  ;;  %v2266_v56 = vld [vmem:[#allocation5 + $0x344] ss:$16 sps:$4 sm:$0xff]   ;;  %v2269_v57 = vld [vmem:[#allocation5 + $0x34c] ss:$16 sps:$4 sm:$0xff]  }
  0x69   :  { %1298 = vmatpush1.bf16.msra.mxu0 %v2183_v59  ;;  %1421 = vmatpush1.bf16.msra.mxu1 %v2184_v61  ;;  %v2267_v59 = vld [vmem:[#allocation5 + $0x348] ss:$16 sps:$4 sm:$0xff]   ;;  %v2275_v61 = vld [vmem:[#allocation5 + $0x36c] ss:$16 sps:$4 sm:$0xff]  }
  0x6a   :  { %1299 = vmatprep.subr.bf16.mxu0 %v2185_v62  ;;  %1422 = vmatprep.subr.bf16.mxu1 %v2187_v63  ;;  %v2270_v62 = vld [vmem:[#allocation5 + $0x360] ss:$16 sps:$4 sm:$0xff]   ;;  %v2273_v63 = vld [vmem:[#allocation5 + $0x368] ss:$16 sps:$4 sm:$0xff]  }
  0x6d   :  { %1300 = vmatpush1.bf16.msra.mxu0 %v2189_v0  ;;  %1423 = vmatpush1.bf16.msra.mxu1 %v2190_v1  ;;  %v2278_v0 = vld [vmem:[#allocation5 + $0x384] ss:$16 sps:$4 sm:$0xff]   ;;  %v2281_v1 = vld [vmem:[#allocation5 + $0x38c] ss:$16 sps:$4 sm:$0xff]  }
  0x6e   :  { %1301 = vmatprep.subr.bf16.mxu0 %v2191_v2  ;;  %1424 = vmatprep.subr.bf16.mxu1 %v2193_v3  ;;  %v2276_v2 = vld [vmem:[#allocation5 + $0x380] ss:$16 sps:$4 sm:$0xff]   ;;  %v2279_v3 = vld [vmem:[#allocation5 + $0x388] ss:$16 sps:$4 sm:$0xff]  }
  0x71   :  { %1302 = vmatpush1.bf16.msra.mxu0 %v2195_v5  ;;  %1425 = vmatpush1.bf16.msra.mxu1 %v2196_v6  ;;  %v2287_v5 = vld [vmem:[#allocation5 + $0x3ac] ss:$16 sps:$4 sm:$0xff]   ;;  %v2282_v6 = vld [vmem:[#allocation5 + $0x3a0] ss:$16 sps:$4 sm:$0xff]  }
  0x72   :  { %1303 = vmatprep.subr.bf16.mxu0 %v2197_v7  ;;  %1426 = vmatprep.subr.bf16.mxu1 %v2199_v8  ;;  %v2285_v7 = vld [vmem:[#allocation5 + $0x3a8] ss:$16 sps:$4 sm:$0xff]   ;;  %v2290_v8 = vld [vmem:[#allocation5 + $0x3c4] ss:$16 sps:$4 sm:$0xff]  }
  0x75   :  { %1304 = vmatpush1.bf16.msra.mxu0 %v2201_v10  ;;  %1427 = vmatpush1.bf16.msra.mxu1 %v2202_v11  ;;  %v2293_v10 = vld [vmem:[#allocation5 + $0x3cc] ss:$16 sps:$4 sm:$0xff]   ;;  %v2288_v11 = vld [vmem:[#allocation5 + $0x3c0] ss:$16 sps:$4 sm:$0xff]  }
  0x76   :  { %1314 = vmatprep.subr.bf16.mxu0 %v2206_v12  ;;  %1437 = vmatprep.subr.bf16.mxu1 %v2209_v13  ;;  %v2291_v12 = vld [vmem:[#allocation5 + $0x3c8] ss:$16 sps:$4 sm:$0xff]   ;;  %v2296_v13 = vld [vmem:[#allocation5 + $0x3e4] ss:$16 sps:$4 sm:$0xff]  }
  0x78   :  { %1306 = vmatmul.mubr.bf16.vlgmr.msra.gmra.mrb[0].mxu0 %v92_v16  ;;  %1429 = vmatmul.mubr.bf16.vlgmr.msra.gmra.mrb[0].mxu1 %v92_v16  ;;  %v2297_v16 = vld [vmem:[#allocation5 + $0x3e8] ss:$16 sps:$4 sm:$0xff]  }
  0x79   :  { %1315 = vmatpush1.bf16.msra.mxu0 %v2204_v15  ;;  %1438 = vmatpush1.bf16.msra.mxu1 %v2207_v17  ;;  %v2294_v15 = vld [vmem:[#allocation5 + $0x3e0] ss:$16 sps:$4 sm:$0xff]   ;;  %v2302_v17 = vld [vmem:[#allocation5 + $0x404] ss:$16 sps:$4 sm:$0xff]  }
  0x7a   :  { %1316 = vmatprep.subr.bf16.mxu0 %v2212_v18  ;;  %1439 = vmatprep.subr.bf16.mxu1 %v2215_v19  ;;  %v2305_v18 = vld [vmem:[#allocation5 + $0x40c] ss:$16 sps:$4 sm:$0xff]   ;;  %v2300_v19 = vld [vmem:[#allocation5 + $0x400] ss:$16 sps:$4 sm:$0xff]  }
  0x7b   :  { %1346 = vmatprep.mubr.bf16.mxu0 %v95_v20  ;;  %1469 = vmatprep.mubr.bf16.mxu1 %v95_v20  ;;  %v94_v20 = vpack.c.bf16 %v2563_v9, %v2563_v9  ;;  %v2314_v9 = vld [vmem:[#allocation5 + $0x444] ss:$16 sps:$4 sm:$0xff]  }
  0x7d   :  { %1317 = vmatpush1.bf16.msra.mxu0 %v2210_v21  ;;  %1440 = vmatpush1.bf16.msra.mxu1 %v2213_v22  ;;  %v2303_v21 = vld [vmem:[#allocation5 + $0x408] ss:$16 sps:$4 sm:$0xff]   ;;  %v2569_v22 = vld.sshfl [vmem:[#allocation2 + $0x8] sm:$0x33 pattern:$0x76325410] }
  0x7e   :  { %1318 = vmatprep.subr.bf16.mxu0 %v2218_v23  ;;  %1441 = vmatprep.subr.bf16.mxu1 %v2221_v24  ;;  %v2308_v23 = vld [vmem:[#allocation5 + $0x424] ss:$16 sps:$4 sm:$0xff]   ;;  %v2311_v24 = vld [vmem:[#allocation5 + $0x42c] ss:$16 sps:$4 sm:$0xff]  }
  0x81   :  { %1319 = vmatpush1.bf16.msra.mxu0 %v2216_v25  ;;  %1442 = vmatpush1.bf16.msra.mxu1 %v2219_v26  ;;  %v85_v25 = vcombine.high %v2569_v22, %v2569_v22 }
  0x82   :  { %1320 = vmatprep.subr.bf16.mxu0 %v2224_v27  ;;  %1443 = vmatprep.subr.bf16.mxu1 %v2227_v28  ;;  %v2306_v27 = vld [vmem:[#allocation5 + $0x420] ss:$16 sps:$4 sm:$0xff]   ;;  %v2309_v28 = vld [vmem:[#allocation5 + $0x428] ss:$16 sps:$4 sm:$0xff]  }
  0x83   :  { %v97_v26 = vpack.c.bf16 %v85_v25, %v85_v25  ;;  %v2390_v25 = vld [vmem:[#allocation5 + $0x5e0] ss:$16 sps:$4 sm:$0xff]  }
  0x85   :  { %1321 = vmatpush1.bf16.msra.mxu0 %v2222_v29  ;;  %1444 = vmatpush1.bf16.msra.mxu1 %v2225_v30  ;;  %v2317_v29 = vld [vmem:[#allocation5 + $0x44c] ss:$16 sps:$4 sm:$0xff]   ;;  %v2312_v30 = vld [vmem:[#allocation5 + $0x440] ss:$16 sps:$4 sm:$0xff]  }
  0x86   :  { %1322 = vmatprep.subr.bf16.mxu0 %v2230_v31  ;;  %1445 = vmatprep.subr.bf16.mxu1 %v2233_v32  ;;  %v2315_v31 = vld [vmem:[#allocation5 + $0x448] ss:$16 sps:$4 sm:$0xff]   ;;  %v2320_v32 = vld [vmem:[#allocation5 + $0x464] ss:$16 sps:$4 sm:$0xff]  }
  0x89   :  { %1323 = vmatpush1.bf16.msra.mxu0 %v2228_v33  ;;  %1446 = vmatpush1.bf16.msra.mxu1 %v2231_v34  ;;  %v2323_v33 = vld [vmem:[#allocation5 + $0x46c] ss:$16 sps:$4 sm:$0xff]   ;;  %v2318_v34 = vld [vmem:[#allocation5 + $0x460] ss:$16 sps:$4 sm:$0xff]  }
  0x8a   :  { %1324 = vmatprep.subr.bf16.mxu0 %v2236_v35  ;;  %1447 = vmatprep.subr.bf16.mxu1 %v2239_v36  ;;  %v2321_v35 = vld [vmem:[#allocation5 + $0x468] ss:$16 sps:$4 sm:$0xff]   ;;  %v2326_v36 = vld [vmem:[#allocation5 + $0x484] ss:$16 sps:$4 sm:$0xff]  }
  0x8d   :  { %1325 = vmatpush1.bf16.msra.mxu0 %v2234_v37  ;;  %1448 = vmatpush1.bf16.msra.mxu1 %v2237_v38  ;;  %v2329_v37 = vld [vmem:[#allocation5 + $0x48c] ss:$16 sps:$4 sm:$0xff]   ;;  %v2324_v38 = vld [vmem:[#allocation5 + $0x480] ss:$16 sps:$4 sm:$0xff]  }
  0x8e   :  { %1326 = vmatprep.subr.bf16.mxu0 %v2242_v39  ;;  %1449 = vmatprep.subr.bf16.mxu1 %v2245_v40  ;;  %v2327_v39 = vld [vmem:[#allocation5 + $0x488] ss:$16 sps:$4 sm:$0xff]   ;;  %v2332_v40 = vld [vmem:[#allocation5 + $0x4a4] ss:$16 sps:$4 sm:$0xff]  }
  0x91   :  { %1327 = vmatpush1.bf16.msra.mxu0 %v2240_v41  ;;  %1450 = vmatpush1.bf16.msra.mxu1 %v2243_v42  ;;  %v2335_v41 = vld [vmem:[#allocation5 + $0x4ac] ss:$16 sps:$4 sm:$0xff]   ;;  %v2330_v42 = vld [vmem:[#allocation5 + $0x4a0] ss:$16 sps:$4 sm:$0xff]  }
  0x92   :  { %1328 = vmatprep.subr.bf16.mxu0 %v2248_v44  ;;  %1451 = vmatprep.subr.bf16.mxu1 %v2251_v45  ;;  %v2333_v44 = vld [vmem:[#allocation5 + $0x4a8] ss:$16 sps:$4 sm:$0xff]   ;;  %v2338_v45 = vld [vmem:[#allocation5 + $0x4c4] ss:$16 sps:$4 sm:$0xff]  }
  0x95   :  { %1329 = vmatpush1.bf16.msra.mxu0 %v2246_v46  ;;  %1452 = vmatpush1.bf16.msra.mxu1 %v2249_v47  ;;  %v2341_v46 = vld [vmem:[#allocation5 + $0x4cc] ss:$16 sps:$4 sm:$0xff]   ;;  %v2336_v47 = vld [vmem:[#allocation5 + $0x4c0] ss:$16 sps:$4 sm:$0xff]  }
  0x96   :  { %1330 = vmatprep.subr.bf16.mxu0 %v2254_v48  ;;  %1453 = vmatprep.subr.bf16.mxu1 %v2257_v49  ;;  %v2339_v48 = vld [vmem:[#allocation5 + $0x4c8] ss:$16 sps:$4 sm:$0xff]   ;;  %v2344_v49 = vld [vmem:[#allocation5 + $0x4e4] ss:$16 sps:$4 sm:$0xff]  }
  0x99   :  { %1331 = vmatpush1.bf16.msra.mxu0 %v2252_v50  ;;  %1454 = vmatpush1.bf16.msra.mxu1 %v2255_v51  ;;  %v2347_v50 = vld [vmem:[#allocation5 + $0x4ec] ss:$16 sps:$4 sm:$0xff]   ;;  %v2342_v51 = vld [vmem:[#allocation5 + $0x4e0] ss:$16 sps:$4 sm:$0xff]  }
  0x9a   :  { %1332 = vmatprep.subr.bf16.mxu0 %v2260_v52  ;;  %1455 = vmatprep.subr.bf16.mxu1 %v2263_v53  ;;  %v2345_v52 = vld [vmem:[#allocation5 + $0x4e8] ss:$16 sps:$4 sm:$0xff]   ;;  %v2350_v53 = vld [vmem:[#allocation5 + $0x504] ss:$16 sps:$4 sm:$0xff]  }
  0x9d   :  { %1333 = vmatpush1.bf16.msra.mxu0 %v2258_v54  ;;  %1456 = vmatpush1.bf16.msra.mxu1 %v2261_v55  ;;  %v2353_v54 = vld [vmem:[#allocation5 + $0x50c] ss:$16 sps:$4 sm:$0xff]   ;;  %v2348_v55 = vld [vmem:[#allocation5 + $0x500] ss:$16 sps:$4 sm:$0xff]  }
  0x9e   :  { %1334 = vmatprep.subr.bf16.mxu0 %v2266_v56  ;;  %1457 = vmatprep.subr.bf16.mxu1 %v2269_v57  ;;  %v2351_v56 = vld [vmem:[#allocation5 + $0x508] ss:$16 sps:$4 sm:$0xff]   ;;  %v2356_v57 = vld [vmem:[#allocation5 + $0x524] ss:$16 sps:$4 sm:$0xff]  }
  0xa1   :  { %1335 = vmatpush1.bf16.msra.mxu0 %v2264_v58  ;;  %1458 = vmatpush1.bf16.msra.mxu1 %v2267_v59  ;;  %v2359_v58 = vld [vmem:[#allocation5 + $0x52c] ss:$16 sps:$4 sm:$0xff]   ;;  %v2354_v59 = vld [vmem:[#allocation5 + $0x520] ss:$16 sps:$4 sm:$0xff]  }
  0xa2   :  { %1336 = vmatprep.subr.bf16.mxu0 %v2272_v60  ;;  %1459 = vmatprep.subr.bf16.mxu1 %v2275_v61  ;;  %v2357_v60 = vld [vmem:[#allocation5 + $0x528] ss:$16 sps:$4 sm:$0xff]   ;;  %v2362_v61 = vld [vmem:[#allocation5 + $0x544] ss:$16 sps:$4 sm:$0xff]  }
  0xa5   :  { %1337 = vmatpush1.bf16.msra.mxu0 %v2270_v62  ;;  %1460 = vmatpush1.bf16.msra.mxu1 %v2273_v63  ;;  %v2365_v62 = vld [vmem:[#allocation5 + $0x54c] ss:$16 sps:$4 sm:$0xff]   ;;  %v2360_v63 = vld [vmem:[#allocation5 + $0x540] ss:$16 sps:$4 sm:$0xff]  }
  0xa6   :  { %1338 = vmatprep.subr.bf16.mxu0 %v2278_v0  ;;  %1461 = vmatprep.subr.bf16.mxu1 %v2281_v1  ;;  %v2363_v0 = vld [vmem:[#allocation5 + $0x548] ss:$16 sps:$4 sm:$0xff]   ;;  %v2368_v1 = vld [vmem:[#allocation5 + $0x564] ss:$16 sps:$4 sm:$0xff]  }
  0xa9   :  { %1339 = vmatpush1.bf16.msra.mxu0 %v2276_v2  ;;  %1462 = vmatpush1.bf16.msra.mxu1 %v2279_v3  ;;  %v2371_v2 = vld [vmem:[#allocation5 + $0x56c] ss:$16 sps:$4 sm:$0xff]   ;;  %v2366_v3 = vld [vmem:[#allocation5 + $0x560] ss:$16 sps:$4 sm:$0xff]  }
  0xaa   :  { %1340 = vmatprep.subr.bf16.mxu0 %v2284_v4  ;;  %1463 = vmatprep.subr.bf16.mxu1 %v2287_v5  ;;  %v2369_v4 = vld [vmem:[#allocation5 + $0x568] ss:$16 sps:$4 sm:$0xff]   ;;  %v2374_v5 = vld [vmem:[#allocation5 + $0x584] ss:$16 sps:$4 sm:$0xff]  }
  0xad   :  { %1341 = vmatpush1.bf16.msra.mxu0 %v2282_v6  ;;  %1464 = vmatpush1.bf16.msra.mxu1 %v2285_v7  ;;  %v2377_v6 = vld [vmem:[#allocation5 + $0x58c] ss:$16 sps:$4 sm:$0xff]   ;;  %v2372_v7 = vld [vmem:[#allocation5 + $0x580] ss:$16 sps:$4 sm:$0xff]  }
  0xae   :  { %1342 = vmatprep.subr.bf16.mxu0 %v2290_v8  ;;  %1465 = vmatprep.subr.bf16.mxu1 %v2293_v10  ;;  %v2375_v8 = vld [vmem:[#allocation5 + $0x588] ss:$16 sps:$4 sm:$0xff]   ;;  %v2380_v10 = vld [vmem:[#allocation5 + $0x5a4] ss:$16 sps:$4 sm:$0xff]  }
  0xb1   :  { %1343 = vmatpush1.bf16.msra.mxu0 %v2288_v11  ;;  %1466 = vmatpush1.bf16.msra.mxu1 %v2291_v12  ;;  %v2383_v11 = vld [vmem:[#allocation5 + $0x5ac] ss:$16 sps:$4 sm:$0xff]   ;;  %v2378_v12 = vld [vmem:[#allocation5 + $0x5a0] ss:$16 sps:$4 sm:$0xff]  }
  0xb2   :  { %1344 = vmatprep.subr.bf16.mxu0 %v2296_v13  ;;  %1467 = vmatprep.subr.bf16.mxu1 %v2299_v14  ;;  %v2381_v13 = vld [vmem:[#allocation5 + $0x5a8] ss:$16 sps:$4 sm:$0xff]   ;;  %v2386_v14 = vld [vmem:[#allocation5 + $0x5c4] ss:$16 sps:$4 sm:$0xff]  }
  0xb5   :  { %1345 = vmatpush1.bf16.msra.mxu0 %v2294_v15  ;;  %1468 = vmatpush1.bf16.msra.mxu1 %v2297_v16  ;;  %v2389_v15 = vld [vmem:[#allocation5 + $0x5cc] ss:$16 sps:$4 sm:$0xff]   ;;  %v2384_v16 = vld [vmem:[#allocation5 + $0x5c0] ss:$16 sps:$4 sm:$0xff]  }
  0xb6   :  { %1355 = vmatprep.subr.bf16.mxu0 %v2302_v17  ;;  %1478 = vmatprep.subr.bf16.mxu1 %v2305_v18  ;;  %v2387_v17 = vld [vmem:[#allocation5 + $0x5c8] ss:$16 sps:$4 sm:$0xff]   ;;  %v2392_v18 = vld [vmem:[#allocation5 + $0x5e4] ss:$16 sps:$4 sm:$0xff]  }
  0xb8   :  { %1347 = vmatmul.mubr.bf16.vlgmr.msra.gmra.mrb[0].mxu0 %v94_v20  ;;  %1470 = vmatmul.mubr.bf16.vlgmr.msra.gmra.mrb[0].mxu1 %v94_v20  ;;  %v1539_v20 = vld [vmem:[#allocation7 + $0x80] sm:$0xff] }
  0xb9   :  { %1356 = vmatpush1.bf16.msra.mxu0 %v2300_v19  ;;  %1479 = vmatpush1.bf16.msra.mxu1 %v2303_v21  ;;  %v2395_v19 = vld [vmem:[#allocation5 + $0x5ec] ss:$16 sps:$4 sm:$0xff]  }
  0xba   :  { %1357 = vmatprep.subr.bf16.mxu0 %v2308_v23  ;;  %1480 = vmatprep.subr.bf16.mxu1 %v2311_v24  ;;  %v1540_v21 = vld [vmem:[#allocation7 + $0x88] sm:$0xff]  ;;  %v1571_v23 = vld [vmem:[#allocation7 + $0x180] sm:$0xff] }
  0xbb   :  { %1387 = vmatprep.mubr.bf16.mxu0 %v97_v26  ;;  %1510 = vmatprep.mubr.bf16.mxu1 %v97_v26  ;;  %v1572_v24 = vld [vmem:[#allocation7 + $0x188] sm:$0xff] }
  0xbc   :  { %v2393_v26 = vld [vmem:[#allocation5 + $0x5e8] ss:$16 sps:$4 sm:$0xff]  }
  0xbd   :  { %1358 = vmatpush1.bf16.msra.mxu0 %v2306_v27  ;;  %1481 = vmatpush1.bf16.msra.mxu1 %v2309_v28  ;;  %v1523_v27 = vld [vmem:[#allocation7] sm:$0xff]  ;;  %v1524_v28 = vld [vmem:[#allocation7 + $0x8] sm:$0xff] }
  0xbe   :  { %1359 = vmatprep.subr.bf16.mxu0 %v2314_v9  ;;  %1482 = vmatprep.subr.bf16.mxu1 %v2317_v29  ;;  %v2014_v9 = vpack.c.bf16 %v1540_v21, %v1539_v20  ;;  %v2046_v29 = vpack.c.bf16 %v1572_v24, %v1571_v23  ;;  %v1581_v20 = vld [vmem:[#allocation7 + $0x1d0] sm:$0xff]  ;;  %v1582_v21 = vld [vmem:[#allocation7 + $0x1d8] sm:$0xff] }
  0xc1   :  { %1360 = vmatpush1.bf16.msra.mxu0 %v2312_v30  ;;  %1483 = vmatpush1.bf16.msra.mxu1 %v2315_v31  ;;  %v1555_v30 = vld [vmem:[#allocation7 + $0x100] sm:$0xff]  ;;  %v1556_v31 = vld [vmem:[#allocation7 + $0x108] sm:$0xff] }
  0xc2   :  { %1361 = vmatprep.subr.bf16.mxu0 %v2320_v32  ;;  %1484 = vmatprep.subr.bf16.mxu1 %v2323_v33  ;;  %v1541_v32 = vld [vmem:[#allocation7 + $0x90] sm:$0xff]  ;;  %v1542_v33 = vld [vmem:[#allocation7 + $0x98] sm:$0xff] }
  0xc5   :  { %1362 = vmatpush1.bf16.msra.mxu0 %v2318_v34  ;;  %1485 = vmatpush1.bf16.msra.mxu1 %v2321_v35  ;;  %v1573_v34 = vld [vmem:[#allocation7 + $0x190] sm:$0xff]  ;;  %v1574_v35 = vld [vmem:[#allocation7 + $0x198] sm:$0xff] }
  0xc6   :  { %1363 = vmatprep.subr.bf16.mxu0 %v2326_v36  ;;  %1486 = vmatprep.subr.bf16.mxu1 %v2329_v37  ;;  %v96_v36 = vpack.c.bf16 %v2569_v22, %v2569_v22  ;;  %v2016_v37 = vpack.c.bf16 %v1524_v28, %v1523_v27  ;;  %v2066_v28 = vpack.c.bf16 %v1582_v21, %v1581_v20 }
  0xc9   :  { %1364 = vmatpush1.bf16.msra.mxu0 %v2324_v38  ;;  %1487 = vmatpush1.bf16.msra.mxu1 %v2327_v39  ;;  %v2048_v38 = vpack.c.bf16 %v1556_v31, %v1555_v30  ;;  %v1525_v39 = vld [vmem:[#allocation7 + $0x10] sm:$0xff]  ;;  %v1551_v30 = vld [vmem:[#allocation7 + $0xe0] sm:$0xff]  ;;  %v1552_v31 = vld [vmem:[#allocation7 + $0xe8] sm:$0xff] }
  0xca   :  { %1365 = vmatprep.subr.bf16.mxu0 %v2332_v40  ;;  %1488 = vmatprep.subr.bf16.mxu1 %v2335_v41  ;;  %v1526_v40 = vld [vmem:[#allocation7 + $0x18] sm:$0xff]  ;;  %v2018_v41 = vpack.c.bf16 %v1542_v33, %v1541_v32  ;;  %v1583_v32 = vld [vmem:[#allocation7 + $0x1e0] sm:$0xff]  ;;  %v1584_v33 = vld [vmem:[#allocation7 + $0x1e8] sm:$0xff] }
  0xcb   :  { %v2020_v22 = vpack.c.bf16 %v1526_v40, %v1525_v39  ;;  %v1536_v39 = vld [vmem:[#allocation7 + $0x68] sm:$0xff]  ;;  %v1567_v40 = vld [vmem:[#allocation7 + $0x160] sm:$0xff] }
  0xcd   :  { %1366 = vmatpush1.bf16.msra.mxu0 %v2330_v42  ;;  %1489 = vmatpush1.bf16.msra.mxu1 %v2333_v44  ;;  %v2050_v42 = vpack.c.bf16 %v1574_v35, %v1573_v34  ;;  %v1557_v44 = vld [vmem:[#allocation7 + $0x110] sm:$0xff] }
  0xce   :  { %1367 = vmatprep.subr.bf16.mxu0 %v2338_v45  ;;  %1490 = vmatprep.subr.bf16.mxu1 %v2341_v46  ;;  %v1558_v45 = vld [vmem:[#allocation7 + $0x118] sm:$0xff]  ;;  %v1543_v46 = vld [vmem:[#allocation7 + $0xa0] sm:$0xff] }
  0xd1   :  { %1368 = vmatpush1.bf16.msra.mxu0 %v2336_v47  ;;  %1491 = vmatpush1.bf16.msra.mxu1 %v2339_v48  ;;  %v1544_v47 = vld [vmem:[#allocation7 + $0xa8] sm:$0xff]  ;;  %v1575_v48 = vld [vmem:[#allocation7 + $0x1a0] sm:$0xff] }
  0xd2   :  { %1369 = vmatprep.subr.bf16.mxu0 %v2344_v49  ;;  %1492 = vmatprep.subr.bf16.mxu1 %v2347_v50  ;;  %v1576_v49 = vld [vmem:[#allocation7 + $0x1a8] sm:$0xff]  ;;  %v2052_v50 = vpack.c.bf16 %v1558_v45, %v1557_v44  ;;  %v1553_v45 = vld [vmem:[#allocation7 + $0xf0] sm:$0xff] }
  0xd5   :  { %1370 = vmatpush1.bf16.msra.mxu0 %v2342_v51  ;;  %1493 = vmatpush1.bf16.msra.mxu1 %v2345_v52  ;;  %v1527_v51 = vld [vmem:[#allocation7 + $0x20] sm:$0xff]  ;;  %v1528_v52 = vld [vmem:[#allocation7 + $0x28] sm:$0xff] }
  0xd6   :  { %1371 = vmatprep.subr.bf16.mxu0 %v2350_v53  ;;  %1494 = vmatprep.subr.bf16.mxu1 %v2353_v54  ;;  %v2022_v53 = vpack.c.bf16 %v1544_v47, %v1543_v46  ;;  %v2054_v54 = vpack.c.bf16 %v1576_v49, %v1575_v48  ;;  %v1554_v46 = vld [vmem:[#allocation7 + $0xf8] sm:$0xff]  ;;  %v1585_v47 = vld [vmem:[#allocation7 + $0x1f0] sm:$0xff] }
  0xd7   :  { %v2042_v48 = vpack.c.bf16 %v1554_v46, %v1553_v45  ;;  %v1586_v49 = vld [vmem:[#allocation7 + $0x1f8] sm:$0xff] }
  0xd9   :  { %1372 = vmatpush1.bf16.msra.mxu0 %v2348_v55  ;;  %1495 = vmatpush1.bf16.msra.mxu1 %v2351_v56  ;;  %v1559_v55 = vld [vmem:[#allocation7 + $0x120] sm:$0xff]  ;;  %v1560_v56 = vld [vmem:[#allocation7 + $0x128] sm:$0xff] }
  0xda   :  { %1373 = vmatprep.subr.bf16.mxu0 %v2356_v57  ;;  %1496 = vmatprep.subr.bf16.mxu1 %v2359_v58  ;;  %v1545_v57 = vld [vmem:[#allocation7 + $0xb0] sm:$0xff]  ;;  %v1546_v58 = vld [vmem:[#allocation7 + $0xb8] sm:$0xff] }
  0xdd   :  { %1374 = vmatpush1.bf16.msra.mxu0 %v2354_v59  ;;  %1497 = vmatpush1.bf16.msra.mxu1 %v2357_v60  ;;  %v1577_v59 = vld [vmem:[#allocation7 + $0x1b0] sm:$0xff]  ;;  %v1578_v60 = vld [vmem:[#allocation7 + $0x1b8] sm:$0xff] }
  0xde   :  { %1375 = vmatprep.subr.bf16.mxu0 %v2362_v61  ;;  %1498 = vmatprep.subr.bf16.mxu1 %v2365_v62  ;;  %v2024_v61 = vpack.c.bf16 %v1528_v52, %v1527_v51  ;;  %v2056_v62 = vpack.c.bf16 %v1560_v56, %v1559_v55  ;;  %v2074_v51 = vpack.c.bf16 %v1586_v49, %v1585_v47  ;;  %v295_v56 = vsub.s32 0, %v2560_v43 }
  0xe1   :  { %1376 = vmatpush1.bf16.msra.mxu0 %v2360_v63  ;;  %1499 = vmatpush1.bf16.msra.mxu1 %v2363_v0  ;;  %v1529_v63 = vld [vmem:[#allocation7 + $0x30] sm:$0xff]  ;;  %v1530_v0 = vld [vmem:[#allocation7 + $0x38] sm:$0xff] }
  0xe2   :  { %1377 = vmatprep.subr.bf16.mxu0 %v2368_v1  ;;  %1500 = vmatprep.subr.bf16.mxu1 %v2371_v2  ;;  %v2026_v1 = vpack.c.bf16 %v1546_v58, %v1545_v57  ;;  %v2058_v2 = vpack.c.bf16 %v1578_v60, %v1577_v59  ;;  %v303_v57 = vsub.s32 2, %v2560_v43  ;;  %v98_v58 = vld [vmem:[%s2600_s3] sm:$0xf]  ;;  %v299_v59 = vsub.s32 1, %v2560_v43 }
  0xe3   :  { %v307_v60 = vsub.s32 3, %v2560_v43 }
  0xe5   :  { %1378 = vmatpush1.bf16.msra.mxu0 %v2366_v3  ;;  %1501 = vmatpush1.bf16.msra.mxu1 %v2369_v4  ;;  %v1561_v3 = vld [vmem:[#allocation7 + $0x130] sm:$0xff]  ;;  %v1562_v4 = vld [vmem:[#allocation7 + $0x138] sm:$0xff] }
  0xe6   :  { %1379 = vmatprep.subr.bf16.mxu0 %v2374_v5  ;;  %1502 = vmatprep.subr.bf16.mxu1 %v2377_v6  ;;  %v1547_v5 = vld [vmem:[#allocation7 + $0xc0] sm:$0xff]  ;;  %v1548_v6 = vld [vmem:[#allocation7 + $0xc8] sm:$0xff] }
  0xe9   :  { %1380 = vmatpush1.bf16.msra.mxu0 %v2372_v7  ;;  %1503 = vmatpush1.bf16.msra.mxu1 %v2375_v8  ;;  %v1579_v7 = vld [vmem:[#allocation7 + $0x1c0] sm:$0xff]  ;;  %v1580_v8 = vld [vmem:[#allocation7 + $0x1c8] sm:$0xff] }
  0xea   :  { %1381 = vmatprep.subr.bf16.mxu0 %v2380_v10  ;;  %1504 = vmatprep.subr.bf16.mxu1 %v2383_v11  ;;  %v2028_v10 = vpack.c.bf16 %v1530_v0, %v1529_v63  ;;  %v2060_v11 = vpack.c.bf16 %v1562_v4, %v1561_v3  ;;  %v300_v63 = vrot.slane %v98_v58, %v299_v59 }
  0xeb   :  { %v308_v0 = vrot.slane %v98_v58, %v307_v60 }
  0xed   :  { %1382 = vmatpush1.bf16.msra.mxu0 %v2378_v12  ;;  %1505 = vmatpush1.bf16.msra.mxu1 %v2381_v13  ;;  %v1531_v12 = vld [vmem:[#allocation7 + $0x40] sm:$0xff]  ;;  %v1532_v13 = vld [vmem:[#allocation7 + $0x48] sm:$0xff] }
  0xee   :  { %1383 = vmatprep.subr.bf16.mxu0 %v2386_v14  ;;  %1506 = vmatprep.subr.bf16.mxu1 %v2389_v15  ;;  %v2030_v14 = vpack.c.bf16 %v1548_v6, %v1547_v5  ;;  %v2062_v15 = vpack.c.bf16 %v1580_v8, %v1579_v7  ;;  %v2032_v23 = vpack.c.bf16 %v1532_v13, %v1531_v12 }
  0xf1   :  { %1384 = vmatpush1.bf16.msra.mxu0 %v2384_v16  ;;  %1507 = vmatpush1.bf16.msra.mxu1 %v2387_v17  ;;  %v1563_v16 = vld [vmem:[#allocation7 + $0x140] sm:$0xff]  ;;  %v1564_v17 = vld [vmem:[#allocation7 + $0x148] sm:$0xff] }
  0xf2   :  { %1385 = vmatprep.subr.bf16.mxu0 %v2392_v18  ;;  %1508 = vmatprep.subr.bf16.mxu1 %v2395_v19  ;;  %v1549_v18 = vld [vmem:[#allocation7 + $0xd0] sm:$0xff]  ;;  %v1550_v19 = vld [vmem:[#allocation7 + $0xd8] sm:$0xff]  ;;  %v2064_v24 = vpack.c.bf16 %v1564_v17, %v1563_v16 }
  0xf3   :  { %v2034_v27 = vpack.c.bf16 %v1550_v19, %v1549_v18  ;;  %v1943_v19 = vld [vmem:[%s2600_s3 + $0x4] ss:$0 sm:$0xff] }
  0xf5   :  { %1386 = vmatpush1.bf16.msra.mxu0 %v2390_v25  ;;  %1509 = vmatpush1.bf16.msra.mxu1 %v2393_v26  ;;  %v1533_v25 = vld [vmem:[#allocation7 + $0x50] sm:$0xff]  ;;  %v1534_v26 = vld [vmem:[#allocation7 + $0x58] sm:$0xff] }
  0xf6   :  { %2015 = vmatprep.subr.bf16.mxu0 %v2014_v9  ;;  %2047 = vmatprep.subr.bf16.mxu1 %v2046_v29  ;;  %v1565_v9 = vld [vmem:[#allocation7 + $0x150] sm:$0xff]  ;;  %v1566_v29 = vld [vmem:[#allocation7 + $0x158] sm:$0xff]  ;;  %v2036_v34 = vpack.c.bf16 %v1534_v26, %v1533_v25 }
  0xf7   :  { %v2068_v35 = vpack.c.bf16 %v1566_v29, %v1565_v9 }
  0xf8   :  { %1388 = vmatmul.mubr.bf16.vlgmr.msra.gmra.mrb[0].mxu0 %v96_v36  ;;  %1511 = vmatmul.mubr.bf16.vlgmr.msra.gmra.mrb[0].mxu1 %v96_v36  ;;  %v2038_v36 = vpack.c.bf16 %v1552_v31, %v1551_v30 }
  0xf9   :  { %2017 = vmatpush3.bf16.msra.mxu0 %v2016_v37  ;;  %2049 = vmatpush3.bf16.msra.mxu1 %v2048_v38  ;;  %v2070_v37 = vpack.c.bf16 %v1584_v33, %v1583_v32  ;;  %v1535_v38 = vld [vmem:[#allocation7 + $0x60] sm:$0xff] }
  0xfa   :  { %2019 = vmatprep.subr.bf16.mxu0 %v2018_v41  ;;  %2051 = vmatprep.subr.bf16.mxu1 %v2050_v42  ;;  %v2040_v41 = vpack.c.bf16 %v1536_v39, %v1535_v38  ;;  %v1568_v42 = vld [vmem:[#allocation7 + $0x168] sm:$0xff] }
  0xfb   :  { %v2072_v44 = vpack.c.bf16 %v1568_v42, %v1567_v40 }
  0xfd   :  { %2021 = vmatpush3.bf16.msra.mxu0 %v2020_v22  ;;  %2053 = vmatpush3.bf16.msra.mxu1 %v2052_v50  ;;  %v1537_v22 = vld [vmem:[#allocation7 + $0x70] sm:$0xff]  ;;  %v1538_v50 = vld [vmem:[#allocation7 + $0x78] sm:$0xff] }
  0xfe   :  { %2023 = vmatprep.subr.bf16.mxu0 %v2022_v53  ;;  %2055 = vmatprep.subr.bf16.mxu1 %v2054_v54  ;;  %v2044_v52 = vpack.c.bf16 %v1538_v50, %v1537_v22  ;;  %v1569_v53 = vld [vmem:[#allocation7 + $0x170] sm:$0xff]  ;;  %v1570_v54 = vld [vmem:[#allocation7 + $0x178] sm:$0xff] }
  0xff   :  { %v2076_v55 = vpack.c.bf16 %v1570_v54, %v1569_v53 }
 0x101   :  { %2025 = vmatpush3.bf16.msra.mxu0 %v2024_v61  ;;  %2057 = vmatpush3.bf16.msra.mxu1 %v2056_v62  ;;  %v296_v61 = vrot.slane %v98_v58, %v295_v56  ;;  %v304_v62 = vrot.slane %v98_v58, %v303_v57 }
 0x102   :  { %2027 = vmatprep.subr.bf16.mxu0 %v2026_v1  ;;  %2059 = vmatprep.subr.bf16.mxu1 %v2058_v2 }
 0x105   :  { %2029 = vmatpush3.bf16.msra.mxu0 %v2028_v10  ;;  %2061 = vmatpush3.bf16.msra.mxu1 %v2060_v11 }
 0x106   :  { %2031 = vmatprep.subr.bf16.mxu0 %v2030_v14  ;;  %2063 = vmatprep.subr.bf16.mxu1 %v2062_v15 }
 0x109   :  { %2033 = vmatpush3.bf16.msra.mxu0 %v2032_v23  ;;  %2065 = vmatpush3.bf16.msra.mxu1 %v2064_v24 }
 0x10a   :  { %2035 = vmatprep.subr.bf16.mxu0 %v2034_v27  ;;  %2067 = vmatprep.subr.bf16.mxu1 %v2066_v28 }
 0x10d   :  { %2037 = vmatpush3.bf16.msra.mxu0 %v2036_v34  ;;  %2069 = vmatpush3.bf16.msra.mxu1 %v2068_v35 }
 0x10e   :  { %2039 = vmatprep.subr.bf16.mxu0 %v2038_v36  ;;  %2071 = vmatprep.subr.bf16.mxu1 %v2070_v37 }
 0x111   :  { %2041 = vmatpush3.bf16.msra.mxu0 %v2040_v41  ;;  %2073 = vmatpush3.bf16.msra.mxu1 %v2072_v44 }
 0x112   :  { %2043 = vmatprep.subr.bf16.mxu0 %v2042_v48  ;;  %2075 = vmatprep.subr.bf16.mxu1 %v2074_v51 }
 0x115   :  { %2045 = vmatpush3.bf16.msra.mxu0 %v2044_v52  ;;  %2077 = vmatpush3.bf16.msra.mxu1 %v2076_v55 }
 0x1cb   :  { %v1389_v1 = vpop.f32.mrb[0].mxu0  ;;  %v1512_v2 = vpop.f32.mrb[0].mxu1 }
 0x1cc   :  { %v2078_v3 = vadd.f32 %v1389_v1, %v296_v61  ;;  %v2080_v4 = vadd.f32 %v1512_v2, %v304_v62  ;;  %v1391_v5 = vpop.f32.mrb[1].mxu0  ;;  %v1514_v6 = vpop.f32.mrb[1].mxu1 }
 0x1cd   :  { %v2079_v7 = vadd.f32 %v1391_v5, %v300_v63  ;;  %v2081_v8 = vadd.f32 %v1514_v6, %v308_v0  ;;  %v1393_v10 = vpop.f32.mrb[2].mxu0  ;;  %v1516_v11 = vpop.f32.mrb[2].mxu1 }
 0x1ce   :  { %v1394_v12 = vpop.f32.mrb[3].mxu0  ;;  %v1517_v13 = vpop.f32.mrb[3].mxu1  ;;  %v1519_v16 = vmax.f32 %v2078_v3, 0.0  ;;  %v1521_v43 = vmax.f32 %v2080_v4, 0.0 }
 0x1cf   :  { %v1520_v14 = vmax.f32 %v2079_v7, 0.0  ;;  %v1522_v15 = vmax.f32 %v2081_v8, 0.0 }
 0x1d1   :  { %1657 = vmatprep.mubr.f32.mxu0 %v1520_v14  ;;  %1727 = vmatprep.mubr.f32.mxu1 %v1522_v15 }
 0x1d2   :  { %1658 = vmatmul.mubr.f32.vlgmr.msra.gmra.mrb[4].mxu0 %v1519_v16  ;;  %1728 = vmatmul.mubr.f32.vlgmr.msra.gmra.mrb[4].mxu1 %v1521_v43 }
 0x2a5   :  { %v1976_v17 = vpop.f32.mrb[4].mxu0  ;;  %v2011_v18 = vpop.f32.mrb[4].mxu1 }
 0x2a6   :  { %v1977_v20 = vpop.f32.mrb[5].mxu0  ;;  %v2012_v21 = vpop.f32.mrb[5].mxu1 }
 0x2a7   :  { %v1978_v23 = vadd.f32 %v1977_v20, %v1976_v17  ;;  %v2013_v24 = vadd.f32 %v2012_v21, %v2011_v18 }
 0x2a9   :  { %v1660_v25 = vadd.f32 %v1978_v23, %v1943_v19 }
 0x2ab   :  { %v1730_v26 = vadd.f32 %v2013_v24, %v1660_v25 }
 0x2ad   :  { %1733 = vst [vmem:[#allocation8] sm:$0x3] %v1730_v26 }
 0x2ae   :  { %2473 = shalt.err (!%p2470_p0)
}
 0x2af   :  { %s2474_s3 = scalar_lea.hbm %s2601_s4, 32 }
 0x2b0   :  { %p2475_p1 = scmp.ne.s32.totalorder %s2601_s4, %s2474_s3  ;;  %p2478_p2 = scmp.lt.u32.totalorder %s2474_s3, %s2601_s4 }
 0x2b2   :  { %p2480_p3 = pnand %p2478_p2, %p2475_p1 }
 0x2b4   :  { %2483 = shalt.err (!%p2480_p3)
}
 0x2b5   :  { %1743 = dma.vmem_to_hbm [thread:$0]  %s1741_s5, 32, %s2601_s4, [#allocation4]  }
 0x2b6   :  { %2488 = dma.done.wait [#allocation4], 32  }
 0x2b7   :  { %2489 = vsyncadd [#allocation4], 4294967264 }
 0x2b8   :  { %1747 = vsyncpa [#allocation3], 1 }
 0x2b9   :  { %1748 = vsyncpa [#allocation6], 1 }
 0x2ba   :  { %1749 = vsyncpa [#allocation4], 1 }

</bundles_post_ra>
